<compile_context>
chip_gen: v7x
topology: tpu7x:2x2x1
jax: 0.10.0
libtpu: 0.0.40
codegen_flags: <defaults>
</compile_context>

<pallas_src>
import jax
import jax.numpy as jnp
from jax.experimental import pallas as pl
from jax.experimental.pallas import tpu as pltpu


def _stochastic_predictor_kernel(seed_ref, bias_ref, x_ref, w_ref,
                                 prob_ref, act_ref):
    """One (TM, H) token tile of the stochastic gate.

    seed_ref : SMEM (1,)    int32    base RNG seed
    bias_ref : SMEM (1,)    float32  Linear(H, 1) bias
    x_ref    : VMEM (TM, H)          activations (native dtype), tokens on sublanes
    w_ref    : VMEM (1, H)           Linear(H, 1) weight row (x.dtype)
    prob_ref : VMEM (1, TM) float32  Bernoulli probabilities (lane-dense row)
    act_ref  : VMEM (1, TM) float32  sampled actions in {0., 1.}
    """
    # Linear(H, 1) on the MXU: contract H of (1, H) against H of (TM, H),
    # giving a lane-dense (1, TM) logits row directly (q @ k.T-style matmul).
    logits = jax.lax.dot_general(
        w_ref[...], x_ref[...],
        dimension_numbers=(((1,), (1,)), ((), ())),
        preferred_element_type=jnp.float32)              # (1, TM)
    probs = jax.nn.sigmoid(logits + bias_ref[0])
    prob_ref[...] = probs

    # --- Bernoulli sampling: counter-based hash PRNG ------------------------
    # Counter = global token index, so every tile / TensorCore draws an
    # independent stream for the same seed (no replay under tiling).
    tm = act_ref.shape[-1]
    base = pl.program_id(0) * tm
    idx = jax.lax.broadcasted_iota(jnp.int32, (1, tm), 1) + base

    seed = seed_ref[0].astype(jnp.uint32)
    h = idx.astype(jnp.uint32) ^ (seed * jnp.uint32(0x9E3779B9))
    h = h ^ (h >> 16)
    h = h * jnp.uint32(0x85EBCA6B)
    h = h ^ (h >> 13)
    h = h * jnp.uint32(0xC2B2AE35)
    h = h ^ (h >> 16) ^ seed          # extra seed fold for stream decorrelation

    # action = 1  iff  U[0,1) < p   (24-bit threshold; <= 2^-24 downward bias).
    r24 = (h >> 8).astype(jnp.int32)                          # uniform in [0, 2^24)
    thr = (probs * jnp.float32(1 << 24)).astype(jnp.int32)    # in [0, 2^24]
    act_ref[...] = (r24 < thr).astype(act_ref.dtype)


def _cdiv(a, b):
    return -(-a // b)


def _round_up(a, m):
    return ((a + m - 1) // m) * m


def _choose_tile(n, h, itemsize, tile_bytes):
    """Tokens per grid step (sublane-axis tile of x)."""
    if n < 128:
        return _round_up(max(n, 8), 8)               # tiny input: one exact tile
    tm = (tile_bytes // (h * itemsize)) // 128 * 128  # ~tile_bytes input per DMA
    tm = max(128, min(8192, tm))                      # bound lane-padded temporaries
    # keep >= 2 grid steps when there is enough data (v7x two-TensorCore split)
    tm = min(tm, max(128, _round_up(_cdiv(n, 2), 128)))
    return tm


def stochastic_predictor(x, w, b, seed, *, tile_bytes=2 << 20):
    """x: (B, S, H) predictor input (any float dtype; bf16 stays bf16 on the wire)
       w: (1, H)    Linear(H, 1) weight
       b: (1,) or (1, 1) Linear(H, 1) bias
       seed: int / int32 scalar for the Bernoulli sampler
       returns (prob_params, actions), each (B, S) float32
    """
    B, S, H = x.shape
    N = B * S
    itemsize = jnp.dtype(x.dtype).itemsize

    tm = _choose_tile(N, H, itemsize, tile_bytes)
    grid_m = _cdiv(N, tm)

    x_flat = x.reshape(N, H)                  # free reshape, no HBM rewrite
    if grid_m == 1 and tm != N:
        # Only tiny (<128-token) inputs get padded (a few rows of a tiny array);
        # large ragged inputs rely on Pallas boundary-block handling so x is
        # never copied in HBM.
        x_flat = jnp.pad(x_flat, ((0, tm - N), (0, 0)))

    w_row = jnp.asarray(w).reshape(1, H).astype(x.dtype)
    bias = jnp.asarray(b, jnp.float32).reshape(-1)[:1]
    seed_arr = jnp.asarray([seed], dtype=jnp.int32)

    cost = pl.CostEstimate(
        flops=2 * N * H,
        transcendentals=N,
        bytes_accessed=N * H * itemsize + 2 * N * 4)

    probs2d, acts2d = pl.pallas_call(
        _stochastic_predictor_kernel,
        grid=(grid_m,),
        out_shape=(
            jax.ShapeDtypeStruct((grid_m, tm), jnp.float32),
            jax.ShapeDtypeStruct((grid_m, tm), jnp.float32),
        ),
        in_specs=[
            pl.BlockSpec(memory_space=pltpu.MemorySpace.SMEM),   # seed
            pl.BlockSpec(memory_space=pltpu.MemorySpace.SMEM),   # bias
            pl.BlockSpec((tm, H), lambda i: (i, 0)),             # x tile (native layout)
            pl.BlockSpec((1, H), lambda i: (0, 0)),              # weight row (resident)
        ],
        out_specs=(
            pl.BlockSpec((1, tm), lambda i: (i, 0)),             # probs row
            pl.BlockSpec((1, tm), lambda i: (i, 0)),             # actions row
        ),
        compiler_params=pltpu.CompilerParams(
            dimension_semantics=("parallel",)),
        cost_estimate=cost,
    )(seed_arr, bias, x_flat, w_row)

    # StochasticPredictor drops the trailing size-1 dim before sampling.
    prob_params = probs2d.reshape(-1)[:N].reshape(B, S)
    actions = acts2d.reshape(-1)[:N].reshape(B, S)
    return prob_params, actions


if __name__ == "__main__":
    B, S, H = 2, 8, 32

    key = jax.random.PRNGKey(0)
    kx, kw, kb = jax.random.split(key, 3)

    # Deterministic synthetic inputs / Linear(H, 1) parameters.
    x = jax.random.normal(kx, (B, S, H), dtype=jnp.float32)
    w = jax.random.normal(kw, (1, H), dtype=jnp.float32) * 0.1
    b = jax.random.normal(kb, (1,), dtype=jnp.float32) * 0.1

    prob_params, actions = stochastic_predictor(x, w, b, seed=1234)
    jax.block_until_ready((prob_params, actions))

    # Reference for the deterministic half of forward() (Linear + sigmoid).
    ref_probs = jax.nn.sigmoid(jnp.einsum("bsh,h->bs", x, w[0]) + b[0])

    assert prob_params.shape == (B, S) and actions.shape == (B, S)
    # The contraction now runs on the MXU, which may evaluate f32 operands at
    # bf16-pass precision; a gate probability only needs ~1e-3 agreement.
    assert bool(jnp.allclose(prob_params, ref_probs, atol=2e-3, rtol=2e-3))
    assert bool(jnp.all((prob_params >= 0.0) & (prob_params <= 1.0)))
    assert bool(jnp.all((actions == 0.0) | (actions == 1.0)))

    print("KERNEL_OK")
</pallas_src>

<mosaic_0001>
module attributes {stable_mosaic.version = 11 : i64} {
  func.func @_stochastic_predictor_kernel(%arg0: i32, %arg1: memref<1xi32, #tpu.memory_space<smem>>, %arg2: memref<1xf32, #tpu.memory_space<smem>>, %arg3: memref<16x32xf32, #tpu.memory_space<vmem>>, %arg4: memref<1x32xf32, #tpu.memory_space<vmem>>, %arg5: memref<1x16xf32, #tpu.memory_space<vmem>>, %arg6: memref<1x16xf32, #tpu.memory_space<vmem>>) attributes {dimension_semantics = [#tpu.dimension_semantics<parallel>], iteration_bounds = array<i64: 1>, scalar_prefetch = 0 : i64, scratch_operands = 0 : i64, tpu.core_type = #tpu.core_type<tc>, window_params = [{transform_indices = @transform_0, window_bounds = array<i64: 1>}, {transform_indices = @transform_1, window_bounds = array<i64: 1>}, {transform_indices = @transform_2, window_bounds = array<i64: 16, 32>}, {pipeline_mode = #tpu.pipeline_mode<synchronous>, transform_indices = @transform_3, window_bounds = array<i64: 1, 32>}, {transform_indices = @transform_4, window_bounds = array<i64: 1, 16>}, {transform_indices = @transform_5, window_bounds = array<i64: 1, 16>}]} {
    %c0 = arith.constant 0 : index
    %c0_0 = arith.constant 0 : index
    %0 = vector.load %arg4[%c0, %c0_0] : memref<1x32xf32, #tpu.memory_space<vmem>>, vector<1x32xf32>
    %c0_1 = arith.constant 0 : index
    %c0_2 = arith.constant 0 : index
    %1 = vector.load %arg3[%c0_1, %c0_2] : memref<16x32xf32, #tpu.memory_space<vmem>>, vector<16x32xf32>
    %cst = arith.constant dense<0.000000e+00> : vector<1x16xf32>
    %2 = tpu.matmul %0, %1, %cst {dimension_numbers = #tpu.dot_dimension_numbers<[1], [1], [0], [0], [0, 0, 1, 0], [], []>} : vector<1x32xf32>, vector<16x32xf32>, vector<1x16xf32> -> vector<1x16xf32>
    %c0_3 = arith.constant 0 : index
    %3 = memref.load %arg2[%c0_3] : memref<1xf32, #tpu.memory_space<smem>>
    %4 = vector.broadcast %3 : f32 to vector<1x16xf32>
    %5 = arith.addf %2, %4 : vector<1x16xf32>
    %6 = arith.negf %5 : vector<1x16xf32>
    %7 = math.exp %6 : vector<1x16xf32>
    %cst_4 = arith.constant 1.000000e+00 : f32
    %8 = vector.broadcast %cst_4 : f32 to vector<1x16xf32>
    %9 = arith.addf %8, %7 : vector<1x16xf32>
    %10 = arith.divf %8, %9 : vector<1x16xf32>
    %c0_5 = arith.constant 0 : index
    %c0_6 = arith.constant 0 : index
    %11 = vector.load %arg5[%c0_5, %c0_6] : memref<1x16xf32, #tpu.memory_space<vmem>>, vector<1x16xf32>
    tpu.vector_store %arg5[%c0_5, %c0_6], %10 {strides = array<i32>} : memref<1x16xf32, #tpu.memory_space<vmem>>, vector<1x16xf32>,
    %c16_i32 = arith.constant 16 : i32
    %12 = arith.muli %arg0, %c16_i32 : i32
    %13 = tpu.iota {dimensions = array<i32: 1>} : vector<1x16xi32>
    %14 = vector.broadcast %12 : i32 to vector<1x16xi32>
    %15 = arith.addi %13, %14 : vector<1x16xi32>
    %c0_7 = arith.constant 0 : index
    %16 = memref.load %arg1[%c0_7] : memref<1xi32, #tpu.memory_space<smem>>
    %c-1640531527_i32 = arith.constant -1640531527 : i32
    %17 = arith.muli %16, %c-1640531527_i32 : i32
    %18 = vector.broadcast %17 : i32 to vector<1x16xi32>
    %19 = arith.xori %15, %18 : vector<1x16xi32>
    %c16_i32_8 = arith.constant 16 : i32
    %20 = vector.broadcast %c16_i32_8 : i32 to vector<1x16xi32>
    %21 = arith.shrui %19, %20 : vector<1x16xi32>
    %22 = arith.xori %19, %21 : vector<1x16xi32>
    %c-2048144789_i32 = arith.constant -2048144789 : i32
    %23 = vector.broadcast %c-2048144789_i32 : i32 to vector<1x16xi32>
    %24 = arith.muli %22, %23 : vector<1x16xi32>
    %c13_i32 = arith.constant 13 : i32
    %25 = vector.broadcast %c13_i32 : i32 to vector<1x16xi32>
    %26 = arith.shrui %24, %25 : vector<1x16xi32>
    %27 = arith.xori %24, %26 : vector<1x16xi32>
    %c-1028477387_i32 = arith.constant -1028477387 : i32
    %28 = vector.broadcast %c-1028477387_i32 : i32 to vector<1x16xi32>
    %29 = arith.muli %27, %28 : vector<1x16xi32>
    %c16_i32_9 = arith.constant 16 : i32
    %30 = vector.broadcast %c16_i32_9 : i32 to vector<1x16xi32>
    %31 = arith.shrui %29, %30 : vector<1x16xi32>
    %32 = arith.xori %29, %31 : vector<1x16xi32>
    %33 = vector.broadcast %16 : i32 to vector<1x16xi32>
    %34 = arith.xori %32, %33 : vector<1x16xi32>
    %c8_i32 = arith.constant 8 : i32
    %35 = vector.broadcast %c8_i32 : i32 to vector<1x16xi32>
    %36 = arith.shrui %34, %35 : vector<1x16xi32>
    %cst_10 = arith.constant 0x4B800000 : f32
    %37 = vector.broadcast %cst_10 : f32 to vector<1x16xf32>
    %38 = arith.mulf %10, %37 : vector<1x16xf32>
    %39 = arith.fptosi %38 : vector<1x16xf32> to vector<1x16xi32>
    %40 = arith.cmpi slt, %36, %39 : vector<1x16xi32>
    %41 = arith.extui %40 : vector<1x16xi1> to vector<1x16xi32>
    %42 = arith.sitofp %41 : vector<1x16xi32> to vector<1x16xf32>
    %c0_11 = arith.constant 0 : index
    %c0_12 = arith.constant 0 : index
    %43 = vector.load %arg6[%c0_11, %c0_12] : memref<1x16xf32, #tpu.memory_space<vmem>>, vector<1x16xf32>
    tpu.vector_store %arg6[%c0_11, %c0_12], %42 {strides = array<i32>} : memref<1x16xf32, #tpu.memory_space<vmem>>, vector<1x16xf32>,
    return
  }
  func.func @transform_0(%arg0: i32) -> i32 {
    %c0_i32 = arith.constant 0 : i32
    %c0_i32_0 = arith.constant 0 : i32
    return %c0_i32 : i32
  }
  func.func @transform_1(%arg0: i32) -> i32 {
    %c0_i32 = arith.constant 0 : i32
    %c0_i32_0 = arith.constant 0 : i32
    return %c0_i32 : i32
  }
  func.func @transform_2(%arg0: i32) -> (i32, i32) {
    %c0_i32 = arith.constant 0 : i32
    %c0_i32_0 = arith.constant 0 : i32
    return %arg0, %c0_i32 : i32, i32
  }
  func.func @transform_3(%arg0: i32) -> (i32, i32) {
    %c0_i32 = arith.constant 0 : i32
    %c0_i32_0 = arith.constant 0 : i32
    %c0_i32_1 = arith.constant 0 : i32
    return %c0_i32, %c0_i32_0 : i32, i32
  }
  func.func @transform_4(%arg0: i32) -> (i32, i32) {
    %c0_i32 = arith.constant 0 : i32
    %c0_i32_0 = arith.constant 0 : i32
    return %arg0, %c0_i32 : i32, i32
  }
  func.func @transform_5(%arg0: i32) -> (i32, i32) {
    %c0_i32 = arith.constant 0 : i32
    %c0_i32_0 = arith.constant 0 : i32
    return %arg0, %c0_i32 : i32, i32
  }
}

</mosaic_0001>

<bundles_post_ra>
// kernel: tpu_custom_call.1
= control target key start
LH: loop header
LB: loop body
LE: loop exit
PB: predicated region body
PF: predicated region fallthrough
CT: control target
= control target key end

     0   :  { %13 = vsyncpa [#allocation5], 0  ;;  %s378_s0 = inlined_call_operand.<no memory space> [shape: s32[1], index: 0, kind: input, shape index: {}]   ;;  %s379_s1 = inlined_call_operand.<no memory space> [shape: f32[1], index: 1, kind: input, shape index: {}]   ;;  %s380_s2 = inlined_call_operand.hbm [shape: f32[16,32], index: 2, kind: input, shape index: {}]   ;;  %s381_s3 = inlined_call_operand.vmem [shape: f32[1,32], index: 3, kind: input, shape index: {}]   ;;  %s382_s4 = inlined_call_operand.hbm [shape: f32[1,16], index: 4, kind: output, shape index: {0}]   ;;  %s383_s5 = inlined_call_operand.hbm [shape: f32[1,16], index: 5, kind: output, shape index: {1}]  }
   0x1   :  { %14 = vsyncpa [#allocation6], 0 }
   0x2   :  { %15 = vsyncpa [#allocation9], 0  ;;  %s290_s18 = smov [#allocation4]   ;;  %s218_s22 = scalar_lea.hbm %s380_s2, 256 }
   0x3   :  { %s25_s19 = sshll.u32 %s290_s18, 4  ;;  %p219_p0 = scmp.ne.s32.totalorder %s380_s2, %s218_s22  ;;  %s26_s19 = int_to_ptr.vmem [resolvable:$true] %s25_s19 }
   0x4   :  { %p222_p1 = scmp.lt.u32.totalorder %s218_s22, %s380_s2 }
   0x6   :  { %p224_p2 = pnand %p222_p1, %p219_p0 }
   0x8   :  { %227 = shalt.err (!%p224_p2)
}
   0x9   :  { %s228_s27 = scalar_lea.vmem %s26_s19, 256  ;;  %p233_p4 = scmp.lt.s32.totalorder %s26_s19, %s26_s19 }
   0xa   :  { %p229_p3 = scmp.ne.s32.totalorder %s26_s19, %s228_s27  ;;  %p234_p5 = scmp.lt.s32.totalorder %s228_s27, %s228_s27 }
   0xc   :  { %p235_p6 = por %p234_p5, %p233_p4 }
   0xe   :  { %p236_p7 = pnand %p235_p6, %p229_p3 }
  0x10   :  { %239 = shalt.err (!%p236_p7)
}
  0x11   :  { %s291_s28 = smov 128   ;;  %s292_s29 = smov 8  }
  0x12   :  { %31 = dma.hbm_to_vmem [thread:$0]  %s380_s2, 256, %s26_s19, [#allocation5], %s291_s28, %s291_s28, %s292_s29  }
  0x13   :  { %284 = dma.done.wait [#allocation5], 256  }
  0x14   :  { %285 = vsyncadd [#allocation5], 4294967040  ;;  %v293_v0 = vmov 0.0|0.0   ;;  %vm294_vm0 = vmmov 0   ;;  %v295_v1 = vmov 0.0   ;;  %vm42_vm1 = vcmask 261120  }
  0x15   :  { %200 = vmatprep.subr.bf16.mxu0 %v293_v0  ;;  %197 = vmatprep.mubr.msk.f32.mxu0 %vm294_vm0, %v295_v1  ;;  %v38_v2 = vld [vmem:[#allocation4] sm:$0xff]  ;;  %v39_v3 = vld [vmem:[#allocation4 + $0x8] sm:$0xff]  ;;  %vm202_vm2 = vmpackc.low %vm42_vm1, %vm42_vm1  ;;  %v131_v6 = vlaneseq  ;;  %s136_s10 = smul.u32 2654435769, %s378_s0  ;;  %v41_v11 = vstv %s379_s1  ;;  %v147_v25 = vstv %s378_s0  ;;  %vm128_vm3 = vcmask 122880  }
  0x16   :  { %v201_v4 = vpack.c.bf16 %v39_v3, %v38_v2  ;;  %v37_v5 = vld [vmem:[%s381_s3] sm:$0x1]  ;;  %s296_s3 = smov [#allocation7]  }
  0x17   :  { %v132_v7 = vand.u32 127, %v131_v6  ;;  %v137_v8 = vstv %s136_s10  ;;  %s162_s13 = sshll.u32 %s296_s3, 4  ;;  %s163_s13 = int_to_ptr.vmem [resolvable:$true] %s162_s13 }
  0x18   :  { %203 = vmatpush3.bf16.xpose.msk.msra.mxu0 %vm202_vm2, %v201_v4  ;;  %s240_s1 = scalar_lea.vmem %s163_s13, 16  ;;  %s244_s16 = scalar_lea.vmem %s163_s13, 32 }
  0x19   :  { %v138_v9 = vxor.u32 %v137_v8, %v132_v7  ;;  %p241_p8 = scmp.ne.s32.totalorder %s163_s13, %s240_s1  ;;  %p245_p9 = scmp.lt.s32.totalorder %s163_s13, %s163_s13 }
  0x1a   :  { %p246_p10 = scmp.lt.s32.totalorder %s244_s16, %s240_s1 }
  0x1b   :  { %v139_v10 = vshrl.u32 %v138_v9, 16 }
  0x1c   :  { %p247_p11 = por %p246_p10, %p245_p9 }
  0x1d   :  { %v140_v12 = vxor.u32 %v139_v10, %v138_v9 }
  0x1e   :  { %p248_p12 = pnand %p247_p11, %p241_p8 }
  0x1f   :  { %198 = vmatmul.mubr.msk.f32.vlgmr.msra.gmra.mrb[0].mxu0 %vm42_vm1, %v37_v5  ;;  %v141_v17 = vmul.u32 2246822507, %v140_v12 }
  0x21   :  { %v142_v18 = vshrl.u32 %v141_v17, 13 }
  0x23   :  { %v143_v19 = vxor.u32 %v142_v18, %v141_v17 }
  0x25   :  { %v144_v21 = vmul.u32 3266489909, %v143_v19 }
  0x27   :  { %v145_v23 = vshrl.u32 %v144_v21, 16 }
  0x29   :  { %v146_v24 = vxor.u32 %v145_v23, %v144_v21 }
  0x2b   :  { %v148_v26 = vxor.u32 %v147_v25, %v146_v24 }
  0xf2   :  { %v118_v13 = vpop.f32.mrb[0].mxu0 }
  0xf3   :  { %v119_v14 = vadd.f32 %v118_v13, %v41_v11  ;;  %v199_v15 = vpop.f32.mrb[1].mxu0 }
  0xf5   :  { %v188_v16 = vmul.f32 -1.442695, %v119_v14 }
  0xf7   :  { %214 = vpow2.f32 %v188_v16 }
 0x101   :  { %v215_v20 = vpop.eup %214 }
 0x102   :  { %v125_v22 = vadd.f32 1.0, %v215_v20 }
 0x104   :  { %216 = vrcp.f32 %v125_v22 }
 0x10e   :  { %v217_v27 = vpop.eup %216 }
 0x10f   :  { %129 = vst.msk [vmem:[#allocation7] sm:$0x1] %vm128_vm3, %v217_v27  ;;  %v150_v28 = vmul.f32 16777216.0, %v217_v27 }
 0x110   :  { %251 = shalt.err (!%p248_p12)
}
 0x111   :  { %s252_s19 = scalar_lea.hbm %s382_s4, 16 }
 0x112   :  { %p253_p13 = scmp.ne.s32.totalorder %s382_s4, %s252_s19  ;;  %p256_p0 = scmp.lt.u32.totalorder %s252_s19, %s382_s4 }
 0x114   :  { %p258_p1 = pnand %p256_p0, %p253_p13 }
 0x116   :  { %261 = shalt.err (!%p258_p1)
}
 0x117   :  { %165 = dma.vmem_to_hbm [thread:$0]  %s163_s13, 16, %s382_s4, [#allocation6]   ;;  %v149_v29 = vshrl.u32 %v148_v26, 8  ;;  %v204_v30 = vtrunc.f32 %v150_v28 }
 0x118   :  { %s297_s25 = smov [#allocation8]  }
 0x119   :  { %s172_s26 = sshll.u32 %s297_s25, 4  ;;  %v205_v31 = vcvt.f32.s32 %v204_v30  ;;  %s173_s26 = int_to_ptr.vmem [resolvable:$true] %s172_s26 }
 0x11a   :  { %s262_s27 = scalar_lea.vmem %s173_s26, 16  ;;  %s266_s28 = scalar_lea.vmem %s173_s26, 32 }
 0x11b   :  { %vm152_vm4 = vcmp.lt.s32.totalorder %v149_v29, %v205_v31  ;;  %p263_p2 = scmp.ne.s32.totalorder %s173_s26, %s262_s27  ;;  %p267_p3 = scmp.lt.s32.totalorder %s173_s26, %s173_s26 }
 0x11c   :  { %v189_v32 = vsel %vm152_vm4, 1.0, %v295_v1  ;;  %p268_p4 = scmp.lt.s32.totalorder %s266_s28, %s262_s27 }
 0x11d   :  { %155 = vst.msk [vmem:[#allocation8] sm:$0x1] %vm128_vm3, %v189_v32 }
 0x11e   :  { %p269_p5 = por %p268_p4, %p267_p3 }
 0x120   :  { %p270_p6 = pnand %p269_p5, %p263_p2 }
 0x122   :  { %273 = shalt.err (!%p270_p6)
}
 0x123   :  { %s274_s30 = scalar_lea.hbm %s383_s5, 16 }
 0x124   :  { %p275_p7 = scmp.ne.s32.totalorder %s383_s5, %s274_s30  ;;  %p278_p8 = scmp.lt.u32.totalorder %s274_s30, %s383_s5 }
 0x126   :  { %p280_p9 = pnand %p278_p8, %p275_p7 }
 0x128   :  { %283 = shalt.err (!%p280_p9)
}
 0x129   :  { %175 = dma.vmem_to_hbm [thread:$0]  %s173_s26, 16, %s383_s5, [#allocation9]  }
 0x12a   :  { %286 = dma.done.wait [#allocation6], 16  }
 0x12b   :  { %287 = vsyncadd [#allocation6], 4294967280 }
 0x12c   :  { %288 = dma.done.wait [#allocation9], 16  }
 0x12d   :  { %289 = vsyncadd [#allocation9], 4294967280 }
 0x12e   :  { %182 = vsyncpa [#allocation5], 1 }
 0x12f   :  { %183 = vsyncpa [#allocation6], 1 }
 0x130   :  { %184 = vsyncpa [#allocation9], 1 }

</bundles_post_ra>
